<compile_context>
chip_gen: v6e
topology: v6e:2x2x1
jax: 0.10.0
libtpu: 0.0.40
codegen_flags: <defaults>
</compile_context>

<pallas_src>
import functools

import jax
import jax.numpy as jnp
from jax import lax
from jax.experimental import pallas as pl
from jax.experimental.pallas import tpu as pltpu

_MiB = 1024 * 1024


# --------------------------------------------------------------------------
# helpers
# --------------------------------------------------------------------------
def _round_up(n, m):
    return ((n + m - 1) // m) * m


def _default_vmem_limit():
    """Generation-aware scoped-VMEM limit (leave headroom under physical)."""
    kind = ""
    try:
        kind = jax.devices()[0].device_kind.lower()
    except Exception:
        pass
    if "v7" in kind:
        return 48 * _MiB      # 64 MiB physical per TC on v7x
    if "v6" in kind:
        return 96 * _MiB      # 128 MiB physical
    if "v5" in kind:
        return 64 * _MiB      # 128 MiB physical, scoped default only 16 MiB
    return 32 * _MiB          # unknown generation: stay conservative


def _pad_chan(p, c_pad):
    p = p.astype(jnp.float32).reshape(-1)
    if p.shape[0] != c_pad:
        p = jnp.pad(p, (0, c_pad - p.shape[0]))
    return p


def _pick_channel_tile(c_pad, per_col_bytes, block_budget, quantum):
    """Largest channel tile (multiple of `quantum`, divides c_pad) fitting the
    VMEM block budget; prefer >= 2 grid steps so both v7x cores get work."""
    cands = [d for d in range(quantum, c_pad + 1, quantum) if c_pad % d == 0]
    cands.sort(reverse=True)
    fitting = [d for d in cands if d * per_col_bytes <= block_budget]
    if not fitting:
        return None
    multi = [d for d in fitting if c_pad // d >= 2]
    return multi[0] if multi else fitting[0]


def _pick_fallback_tiles(c_pad, n_rows, per_elem_bytes, block_budget):
    """(tc, tn) for the row-tiled two-pass path."""
    tc = 128
    for cand in sorted(
        (d for d in range(128, c_pad + 1, 128) if c_pad % d == 0), reverse=True
    ):
        if cand * 512 * per_elem_bytes <= block_budget:
            tc = cand
            break
    tn = 8
    while tn < 8192 and (tn * 2) * tc * per_elem_bytes <= block_budget:
        tn *= 2
    tn = min(tn, _round_up(n_rows, 8))
    return tc, tn


# --------------------------------------------------------------------------
# kernels
# --------------------------------------------------------------------------
def _bn2d_kernel(x_ref, gamma_ref, beta_ref, o_ref, *, eps, count):
    """One-pass stats + normalize. x_ref: (N, TC); gamma/beta: (1, TC).

    Re-reads x_ref (VMEM loads are cheap) instead of materializing a centered
    f32 temporary; output is a single fused multiply-add per element."""
    inv_n = 1.0 / count
    mean = jnp.sum(x_ref[...].astype(jnp.float32), axis=0, keepdims=True) * inv_n
    var = (
        jnp.sum(
            jnp.square(x_ref[...].astype(jnp.float32) - mean),
            axis=0,
            keepdims=True,
        )
        * inv_n
    )  # biased variance (PyTorch training-mode normalization)
    scale = lax.rsqrt(var + eps) * gamma_ref[...].astype(jnp.float32)
    shift = beta_ref[...].astype(jnp.float32) - mean * scale
    o_ref[...] = (x_ref[...].astype(jnp.float32) * scale + shift).astype(o_ref.dtype)


def _bn3d_kernel(x_ref, gamma_ref, beta_ref, o_ref, *, eps, count):
    """Native (B, TC, L) block: C on sublanes, L on lanes; stats over (B, L)."""
    inv_n = 1.0 / count
    s = jnp.sum(
        jnp.sum(x_ref[...].astype(jnp.float32), axis=2, keepdims=True),
        axis=0,
        keepdims=True,
    )  # (1, TC, 1)
    mean = s * inv_n
    var = (
        jnp.sum(
            jnp.sum(
                jnp.square(x_ref[...].astype(jnp.float32) - mean),
                axis=2,
                keepdims=True,
            ),
            axis=0,
            keepdims=True,
        )
        * inv_n
    )
    g = gamma_ref[...].astype(jnp.float32)[None]  # (1, TC, 1)
    b = beta_ref[...].astype(jnp.float32)[None]
    scale = lax.rsqrt(var + eps) * g
    shift = b - mean * scale
    o_ref[...] = (x_ref[...].astype(jnp.float32) * scale + shift).astype(o_ref.dtype)


def _bn_stats_kernel(x_ref, sum_ref, sq_ref):
    """Accumulate per-channel sum / sum-of-squares across row tiles.
    Output blocks are resident across the (last, 'arbitrary') row axis."""

    @pl.when(pl.program_id(1) == 0)
    def _():
        sum_ref[...] = jnp.zeros_like(sum_ref)
        sq_ref[...] = jnp.zeros_like(sq_ref)

    x = x_ref[...].astype(jnp.float32)
    sum_ref[...] += jnp.sum(x, axis=0, keepdims=True)
    sq_ref[...] += jnp.sum(x * x, axis=0, keepdims=True)


def _bn_apply_kernel(x_ref, scale_ref, shift_ref, o_ref):
    o_ref[...] = (
        x_ref[...].astype(jnp.float32) * scale_ref[...] + shift_ref[...]
    ).astype(o_ref.dtype)


# --------------------------------------------------------------------------
# drivers
# --------------------------------------------------------------------------
def _bn2d_two_pass(x2, gamma2, beta2, eps, tc, tn, vmem_limit):
    """Row-tiled fallback for batches too large to keep resident in VMEM."""
    n_true, c_pad = x2.shape
    n_pad = _round_up(n_true, tn)
    if n_pad != n_true:
        # zero rows contribute 0 to sum / sumsq; we divide by the true count
        x2 = jnp.pad(x2, ((0, n_pad - n_true), (0, 0)))
    grid = (c_pad // tc, n_pad // tn)

    sums, sqs = pl.pallas_call(
        _bn_stats_kernel,
        out_shape=(
            jax.ShapeDtypeStruct((1, c_pad), jnp.float32),
            jax.ShapeDtypeStruct((1, c_pad), jnp.float32),
        ),
        grid=grid,
        in_specs=[pl.BlockSpec((tn, tc), lambda j, r: (r, j))],
        out_specs=(
            pl.BlockSpec((1, tc), lambda j, r: (0, j)),
            pl.BlockSpec((1, tc), lambda j, r: (0, j)),
        ),
        compiler_params=pltpu.CompilerParams(
            dimension_semantics=("parallel", "arbitrary"),
            vmem_limit_bytes=vmem_limit,
        ),
    )(x2)

    inv_n = 1.0 / n_true
    mean = sums * inv_n
    # TODO(synk): E[x^2]-mean^2 (f32 accumulation) is cancellation-prone for
    # data with a very large mean; a centered second stats pass would fix it
    # at the cost of one extra HBM read of x.
    var = jnp.maximum(sqs * inv_n - mean * mean, 0.0)
    scale = lax.rsqrt(var + eps) * gamma2
    shift = beta2 - mean * scale

    y = pl.pallas_call(
        _bn_apply_kernel,
        out_shape=jax.ShapeDtypeStruct((n_pad, c_pad), x2.dtype),
        grid=grid,
        in_specs=[
            pl.BlockSpec((tn, tc), lambda j, r: (r, j)),
            pl.BlockSpec((1, tc), lambda j, r: (0, j)),
            pl.BlockSpec((1, tc), lambda j, r: (0, j)),
        ],
        out_specs=pl.BlockSpec((tn, tc), lambda j, r: (r, j)),
        compiler_params=pltpu.CompilerParams(
            dimension_semantics=("parallel", "parallel"),
            vmem_limit_bytes=vmem_limit,
        ),
    )(x2, scale, shift)
    return y[:n_true]


def _forward_2d(x, gamma, beta, eps, vmem_limit_bytes, force_two_pass=False):
    n, c = x.shape
    vmem_limit = vmem_limit_bytes or _default_vmem_limit()
    block_budget = int(vmem_limit * 0.6)  # headroom for compiler scratch/sems

    c_pad = _round_up(c, 128)  # lane-dense stores (unmasked vst)
    if c_pad != c:
        x = jnp.pad(x, ((0, 0), (0, c_pad - c)))
    gamma2 = _pad_chan(gamma, c_pad).reshape(1, c_pad)
    beta2 = _pad_chan(beta, c_pad).reshape(1, c_pad)

    in_b = x.dtype.itemsize
    # double-buffered in + out blocks, plus ~1.5 f32 working temporaries
    per_col = n * (2 * in_b + 2 * in_b + 6.0)
    tc = None if force_two_pass else _pick_channel_tile(
        c_pad, per_col, block_budget, 128
    )

    if tc is not None:
        out = pl.pallas_call(
            functools.partial(_bn2d_kernel, eps=eps, count=n),
            out_shape=jax.ShapeDtypeStruct((n, c_pad), x.dtype),
            grid=(c_pad // tc,),
            in_specs=[
                pl.BlockSpec((n, tc), lambda j: (0, j)),  # full batch, one slab
                pl.BlockSpec((1, tc), lambda j: (0, j)),
                pl.BlockSpec((1, tc), lambda j: (0, j)),
            ],
            out_specs=pl.BlockSpec((n, tc), lambda j: (0, j)),
            compiler_params=pltpu.CompilerParams(
                dimension_semantics=("parallel",),
                vmem_limit_bytes=vmem_limit,
            ),
        )(x, gamma2, beta2)
    else:
        per_elem = 2 * in_b + 2 * in_b + 6.0
        tc_fb, tn = _pick_fallback_tiles(c_pad, n, per_elem, block_budget)
        out = _bn2d_two_pass(x, gamma2, beta2, eps, tc_fb, tn, vmem_limit)

    return out[:, :c] if c_pad != c else out


def _forward_3d(x, gamma, beta, eps, vmem_limit_bytes):
    b, c, l = x.shape
    vmem_limit = vmem_limit_bytes or _default_vmem_limit()
    block_budget = int(vmem_limit * 0.6)

    c_pad = _round_up(c, 8)  # channels ride the sublane axis here
    if c_pad != c:
        x = jnp.pad(x, ((0, 0), (0, c_pad - c), (0, 0)))
    gamma3 = _pad_chan(gamma, c_pad).reshape(c_pad, 1)
    beta3 = _pad_chan(beta, c_pad).reshape(c_pad, 1)

    in_b = x.dtype.itemsize
    per_chan = b * l * (2 * in_b + 2 * in_b + 6.0)
    tc = _pick_channel_tile(c_pad, per_chan, block_budget, 8)

    if tc is not None:
        out = pl.pallas_call(
            functools.partial(_bn3d_kernel, eps=eps, count=b * l),
            out_shape=jax.ShapeDtypeStruct((b, c_pad, l), x.dtype),
            grid=(c_pad // tc,),
            in_specs=[
                pl.BlockSpec((b, tc, l), lambda j: (0, j, 0)),
                pl.BlockSpec((tc, 1), lambda j: (j, 0)),
                pl.BlockSpec((tc, 1), lambda j: (j, 0)),
            ],
            out_specs=pl.BlockSpec((b, tc, l), lambda j: (0, j, 0)),
            compiler_params=pltpu.CompilerParams(
                dimension_semantics=("parallel",),
                vmem_limit_bytes=vmem_limit,
            ),
        )(x, gamma3, beta3)
        return out[:, :c, :] if c_pad != c else out

    # TODO(synk): native row-tiled fallback in the (B, C, L) layout for huge
    # B*L; for now flatten to (B*L, C) and reuse the 2D two-pass path (costs
    # two extra HBM transposes in the wrapper).
    x2 = jnp.transpose(x[:, :c, :], (0, 2, 1)).reshape(b * l, c)
    out2 = _forward_2d(x2, gamma, beta, eps, vmem_limit_bytes)
    return jnp.transpose(out2.reshape(b, l, c), (0, 2, 1))


def batchnorm1d_forward(x, gamma, beta, eps=1e-5, vmem_limit_bytes=None,
                        force_two_pass=False):
    """Training-mode BatchNorm1d forward. x: (B, C) or (B, C, L)."""
    if x.ndim == 2:
        return _forward_2d(x, gamma, beta, eps, vmem_limit_bytes, force_two_pass)
    if x.ndim == 3:
        return _forward_3d(x, gamma, beta, eps, vmem_limit_bytes)
    raise ValueError("BatchNorm1d expects (B, C) or (B, C, L) input")


# TODO(synk): running_mean/running_var momentum updates and the eval-mode
# (use-running-stats) path are stateful and not implemented; this is the
# training-mode forward a freshly constructed nn.BatchNorm1d computes.


# --------------------------------------------------------------------------
# self-test
# --------------------------------------------------------------------------
if __name__ == "__main__":
    eps = 1e-5

    def ref_bn(x, gamma, beta):
        axes = (0,) if x.ndim == 2 else (0, 2)
        mean = jnp.mean(x, axis=axes, keepdims=True)
        var = jnp.mean(jnp.square(x - mean), axis=axes, keepdims=True)  # biased
        g = gamma.reshape((1, -1) + (1,) * (x.ndim - 2))
        b = beta.reshape((1, -1) + (1,) * (x.ndim - 2))
        return (x - mean) * lax.rsqrt(var + eps) * g + b

    ok = True

    # (B, C) path -- matches nn.BatchNorm1d(32) on an (8, 32) batch.
    B, C = 8, 32
    x = jax.random.normal(jax.random.PRNGKey(0), (B, C), dtype=jnp.float32)
    gamma = jnp.ones((C,), jnp.float32)   # fresh-module affine params
    beta = jnp.zeros((C,), jnp.float32)
    out = jax.block_until_ready(batchnorm1d_forward(x, gamma, beta, eps))
    ok &= out.shape == x.shape
    ok &= bool(jnp.allclose(out, ref_bn(x, gamma, beta), atol=1e-4, rtol=1e-4))

    # (B, C, L) path handled natively (no wrapper transposes).
    B3, C3, L3 = 2, 4, 16
    k1, k2, k3 = jax.random.split(jax.random.PRNGKey(0), 3)
    x3 = jax.random.normal(k1, (B3, C3, L3), dtype=jnp.float32)
    g3 = 1.0 + 0.1 * jax.random.normal(k2, (C3,), dtype=jnp.float32)
    b3 = 0.1 * jax.random.normal(k3, (C3,), dtype=jnp.float32)
    out3 = jax.block_until_ready(batchnorm1d_forward(x3, g3, b3, eps))
    ok &= out3.shape == x3.shape
    ok &= bool(jnp.allclose(out3, ref_bn(x3, g3, b3), atol=1e-4, rtol=1e-4))

    # Row-tiled two-pass fallback (exercised explicitly; used automatically
    # when the whole batch does not fit the VMEM budget). Rows deliberately
    # not a multiple of 8.
    Nf, Cf = 100, 32
    xf = jax.random.normal(jax.random.PRNGKey(1), (Nf, Cf), dtype=jnp.float32)
    gf = jnp.ones((Cf,), jnp.float32)
    bf = jnp.zeros((Cf,), jnp.float32)
    outf = jax.block_until_ready(
        batchnorm1d_forward(xf, gf, bf, eps, force_two_pass=True)
    )
    ok &= outf.shape == xf.shape
    ok &= bool(jnp.allclose(outf, ref_bn(xf, gf, bf), atol=1e-4, rtol=1e-4))

    if not ok:
        raise SystemExit("mismatch vs reference")
    print("KERNEL_OK")
</pallas_src>

<mosaic_0001>
module attributes {stable_mosaic.version = 11 : i64} {
  func.func @_bn2d_kernel(%arg0: i32, %arg1: memref<8x128xf32, #tpu.memory_space<vmem>>, %arg2: memref<1x128xf32, #tpu.memory_space<vmem>>, %arg3: memref<1x128xf32, #tpu.memory_space<vmem>>, %arg4: memref<8x128xf32, #tpu.memory_space<vmem>>) attributes {dimension_semantics = [#tpu.dimension_semantics<parallel>], iteration_bounds = array<i64: 1>, scalar_prefetch = 0 : i64, scratch_operands = 0 : i64, tpu.core_type = #tpu.core_type<tc>, window_params = [{transform_indices = @transform_0, window_bounds = array<i64: 8, 128>}, {transform_indices = @transform_1, window_bounds = array<i64: 1, 128>}, {transform_indices = @transform_2, window_bounds = array<i64: 1, 128>}, {transform_indices = @transform_3, window_bounds = array<i64: 8, 128>}]} {
    %c0 = arith.constant 0 : index
    %c0_0 = arith.constant 0 : index
    %0 = vector.load %arg1[%c0, %c0_0] : memref<8x128xf32, #tpu.memory_space<vmem>>, vector<8x128xf32>
    %cst = arith.constant dense<0.000000e+00> : vector<128xf32>
    %1 = vector.multi_reduction <add>, %0, %cst [0] : vector<8x128xf32> to vector<128xf32>
    %2 = vector.shape_cast %1 : vector<128xf32> to vector<1x128xf32>
    %cst_1 = arith.constant 1.250000e-01 : f32
    %3 = vector.broadcast %cst_1 : f32 to vector<1x128xf32>
    %4 = arith.mulf %2, %3 : vector<1x128xf32>
    %c0_2 = arith.constant 0 : index
    %c0_3 = arith.constant 0 : index
    %5 = vector.load %arg1[%c0_2, %c0_3] : memref<8x128xf32, #tpu.memory_space<vmem>>, vector<8x128xf32>
    %6 = vector.broadcast %4 : vector<1x128xf32> to vector<8x128xf32>
    %7 = arith.subf %5, %6 : vector<8x128xf32>
    %8 = arith.mulf %7, %7 : vector<8x128xf32>
    %cst_4 = arith.constant dense<0.000000e+00> : vector<128xf32>
    %9 = vector.multi_reduction <add>, %8, %cst_4 [0] : vector<8x128xf32> to vector<128xf32>
    %10 = vector.shape_cast %9 : vector<128xf32> to vector<1x128xf32>
    %cst_5 = arith.constant 1.250000e-01 : f32
    %11 = vector.broadcast %cst_5 : f32 to vector<1x128xf32>
    %12 = arith.mulf %10, %11 : vector<1x128xf32>
    %cst_6 = arith.constant 9.99999974E-6 : f32
    %13 = vector.broadcast %cst_6 : f32 to vector<1x128xf32>
    %14 = arith.addf %12, %13 : vector<1x128xf32>
    %15 = math.rsqrt %14 : vector<1x128xf32>
    %c0_7 = arith.constant 0 : index
    %c0_8 = arith.constant 0 : index
    %16 = vector.load %arg2[%c0_7, %c0_8] : memref<1x128xf32, #tpu.memory_space<vmem>>, vector<1x128xf32>
    %17 = arith.mulf %15, %16 : vector<1x128xf32>
    %c0_9 = arith.constant 0 : index
    %c0_10 = arith.constant 0 : index
    %18 = vector.load %arg3[%c0_9, %c0_10] : memref<1x128xf32, #tpu.memory_space<vmem>>, vector<1x128xf32>
    %19 = arith.mulf %4, %17 : vector<1x128xf32>
    %20 = arith.subf %18, %19 : vector<1x128xf32>
    %c0_11 = arith.constant 0 : index
    %c0_12 = arith.constant 0 : index
    %21 = vector.load %arg1[%c0_11, %c0_12] : memref<8x128xf32, #tpu.memory_space<vmem>>, vector<8x128xf32>
    %22 = vector.broadcast %17 : vector<1x128xf32> to vector<8x128xf32>
    %23 = arith.mulf %21, %22 : vector<8x128xf32>
    %24 = vector.broadcast %20 : vector<1x128xf32> to vector<8x128xf32>
    %25 = arith.addf %23, %24 : vector<8x128xf32>
    %c0_13 = arith.constant 0 : index
    %c0_14 = arith.constant 0 : index
    %26 = vector.load %arg4[%c0_13, %c0_14] : memref<8x128xf32, #tpu.memory_space<vmem>>, vector<8x128xf32>
    tpu.vector_store %arg4[%c0_13, %c0_14], %25 {strides = array<i32>} : memref<8x128xf32, #tpu.memory_space<vmem>>, vector<8x128xf32>,
    return
  }
  func.func @transform_0(%arg0: i32) -> (i32, i32) {
    %c0_i32 = arith.constant 0 : i32
    %c0_i32_0 = arith.constant 0 : i32
    return %c0_i32, %arg0 : i32, i32
  }
  func.func @transform_1(%arg0: i32) -> (i32, i32) {
    %c0_i32 = arith.constant 0 : i32
    %c0_i32_0 = arith.constant 0 : i32
    return %c0_i32, %arg0 : i32, i32
  }
  func.func @transform_2(%arg0: i32) -> (i32, i32) {
    %c0_i32 = arith.constant 0 : i32
    %c0_i32_0 = arith.constant 0 : i32
    return %c0_i32, %arg0 : i32, i32
  }
  func.func @transform_3(%arg0: i32) -> (i32, i32) {
    %c0_i32 = arith.constant 0 : i32
    %c0_i32_0 = arith.constant 0 : i32
    return %c0_i32, %arg0 : i32, i32
  }
}

</mosaic_0001>

<bundles_post_ra>
// kernel: tpu_custom_call.1
= control target key start
LH: loop header
LB: loop body
LE: loop exit
PB: predicated region body
PF: predicated region fallthrough
CT: control target
= control target key end

     0   :  { %8 = vsyncpa [#allocation3], 0  ;;  %s161_s0 = inlined_call_operand.hbm [shape: f32[8,128], index: 0, kind: input, shape index: {}]   ;;  %s162_s1 = inlined_call_operand.vmem [shape: f32[1,128], index: 1, kind: input, shape index: {}]   ;;  %s163_s2 = inlined_call_operand.vmem [shape: f32[1,128], index: 2, kind: input, shape index: {}]   ;;  %s164_s3 = inlined_call_operand.hbm [shape: f32[8,128], index: 3, kind: output, shape index: {}]  }
   0x1   :  { %9 = vsyncpa [#allocation4], 0  ;;  %s127_s12 = smov [#allocation2]  }
   0x2   :  { %s16_s13 = sshll.u32 %s127_s12, 4  ;;  %s17_s13 = int_to_ptr.vmem [resolvable:$true] %s16_s13 }
   0x3   :  { %s91_s14 = scalar_lea.vmem %s17_s13, 128  ;;  %p96_p1 = scmp.lt.s32.totalorder %s17_s13, %s17_s13 }
   0x4   :  { %p92_p0 = scmp.ne.s32.totalorder %s17_s13, %s91_s14  ;;  %p97_p2 = scmp.lt.s32.totalorder %s91_s14, %s91_s14 }
   0x6   :  { %p98_p3 = por %p97_p2, %p96_p1 }
   0x8   :  { %p99_p4 = pnand %p98_p3, %p92_p0 }
   0xa   :  { %102 = shalt.err (!%p99_p4)
}
   0xb   :  { %19 = dma.hbm_to_vmem [thread:$0]  %s161_s0, 128, %s17_s13, [#allocation3]  }
   0xc   :  { %123 = dma.done.wait [#allocation3], 128  }
   0xd   :  { %124 = vsyncadd [#allocation3], 4294967168  ;;  %v27_v0 = vld [vmem:[#allocation2] sm:$0xff]  ;;  %v51_v18 = vlaneseq  ;;  %s128_s20 = smov [#allocation5]  }
   0xe   :  { %v28_v1 = vrot.slane %v27_v0, 4  ;;  %v46_v20 = vld [vmem:[%s162_s1] sm:$0x1]  ;;  %s70_s21 = sshll.u32 %s128_s20, 4  ;;  %s71_s21 = int_to_ptr.vmem [resolvable:$true] %s70_s21 }
   0xf   :  { %v52_v19 = vshrl.u32 %v51_v18, 7  ;;  %v48_v24 = vld [vmem:[%s163_s2] sm:$0x1]  ;;  %s103_s22 = scalar_lea.vmem %s71_s21, 128  ;;  %p108_p6 = scmp.lt.s32.totalorder %s71_s21, %s71_s21 }
  0x10   :  { %v29_v2 = vadd.f32 %v28_v1, %v27_v0  ;;  %p104_p5 = scmp.ne.s32.totalorder %s71_s21, %s103_s22  ;;  %p109_p7 = scmp.lt.s32.totalorder %s103_s22, %s103_s22 }
  0x11   :  { %v53_v21 = vsub.s32 0, %v52_v19 }
  0x12   :  { %v30_v3 = vrot.slane %v29_v2, 2  ;;  %p110_p8 = por %p109_p7, %p108_p6 }
  0x14   :  { %v31_v4 = vadd.f32 %v30_v3, %v29_v2  ;;  %p111_p9 = pnand %p110_p8, %p104_p5 }
  0x16   :  { %v32_v5 = vrot.slane %v31_v4, 1 }
  0x18   :  { %v33_v6 = vadd.f32 %v32_v5, %v31_v4 }
  0x1a   :  { %v34_v7 = vmul.f32 0.125, %v33_v6 }
  0x1c   :  { %v35_v8 = vsub.f32 %v27_v0, %v34_v7 }
  0x1e   :  { %v36_v9 = vmul.f32 %v35_v8, %v35_v8 }
  0x20   :  { %v37_v10 = vrot.slane %v36_v9, 4 }
  0x22   :  { %v38_v11 = vadd.f32 %v37_v10, %v36_v9 }
  0x24   :  { %v39_v12 = vrot.slane %v38_v11, 2 }
  0x26   :  { %v40_v13 = vadd.f32 %v39_v12, %v38_v11 }
  0x28   :  { %v41_v14 = vrot.slane %v40_v13, 1 }
  0x2a   :  { %v42_v15 = vadd.f32 %v41_v14, %v40_v13 }
  0x2c   :  { %v43_v16 = vmul.f32 0.125, %v42_v15 }
  0x2e   :  { %v44_v17 = vadd.f32 1e-05, %v43_v16 }
  0x30   :  { %81 = vrsqrt.f32 %v44_v17 }
  0x3d   :  { %v82_v22 = vpop.eup %81 }
  0x3e   :  { %v47_v23 = vmul.f32 %v82_v22, %v46_v20 }
  0x40   :  { %v49_v25 = vmul.f32 %v47_v23, %v34_v7  ;;  %v54_v26 = vrot.slane %v47_v23, %v53_v21 }
  0x42   :  { %v50_v27 = vsub.f32 %v48_v24, %v49_v25  ;;  %v55_v28 = vmul.f32 %v54_v26, %v27_v0 }
  0x44   :  { %v60_v29 = vrot.slane %v50_v27, %v53_v21 }
  0x46   :  { %v62_v30 = vadd.f32 %v60_v29, %v55_v28 }
  0x48   :  { %63 = vst [vmem:[#allocation5] sm:$0xff] %v62_v30 }
  0x49   :  { %114 = shalt.err (!%p111_p9)
}
  0x4a   :  { %73 = dma.vmem_to_hbm [thread:$0]  %s71_s21, 128, %s164_s3, [#allocation4]  }
  0x4b   :  { %125 = dma.done.wait [#allocation4], 128  }
  0x4c   :  { %126 = vsyncadd [#allocation4], 4294967168 }
  0x4d   :  { %77 = vsyncpa [#allocation3], 1 }
  0x4e   :  { %78 = vsyncpa [#allocation4], 1 }

</bundles_post_ra>
